<compile_context>
chip_gen: v5e
topology: v5e:2x2
jax: 0.10.0
libtpu: 0.0.40
codegen_flags: <defaults>
</compile_context>

<pallas_src>
import functools
import math

import jax
import jax.numpy as jnp
from jax.experimental import pallas as pl
from jax.experimental.pallas import tpu as pltpu

BN_EPS = 1e-5
LANE = 128


def _round_up(n, m):
    return ((n + m - 1) // m) * m


def _nbytes(shape, dtype):
    return math.prod(shape) * jnp.dtype(dtype).itemsize


def _fcnet_kernel(x_ref, w1_ref, p1_ref, wh_ref, ph_ref, wo_ref, bo_ref,
                  o_ref, h_ref, *, activation):
    """One grid step == one layer of the network.

    step 0            : fc1 -> BN -> act          (x_ref, w1_ref, p1_ref)
    steps 1..L-1      : hidden Linear -> BN -> act (streamed wh_ref / ph_ref)
    step L-1 (also)   : fc_out                     (wo_ref, bo_ref)
    The (B, N) activation lives in the bf16 VMEM scratch h_ref across steps.
    """
    step = pl.program_id(0)
    last = pl.num_programs(0) - 1

    def act(z):
        if activation == "relu":
            return jnp.maximum(z, 0.0)
        return jnp.tanh(z)

    def bn_act_store(z, p):
        # p rows: [linear bias, BN gamma, BN beta]. Padded lanes carry
        # bias = gamma = beta = 0, so they stay exactly zero through the
        # folded BN affine and the activation (feeding zeros to the next W).
        z = z + p[0:1, :]
        inv_n = 1.0 / z.shape[0]
        mean = jnp.sum(z, axis=0, keepdims=True) * inv_n
        ex2 = jnp.sum(z * z, axis=0, keepdims=True) * inv_n
        var = ex2 - mean * mean                       # biased (training) var
        s = p[1:2, :] * jax.lax.rsqrt(var + BN_EPS)   # folded BN scale
        t = p[2:3, :] - mean * s                      # folded BN shift
        h_ref[...] = act(z * s + t).astype(h_ref.dtype)

    @pl.when(step == 0)
    def _():
        z = jnp.dot(x_ref[...].astype(jnp.bfloat16), w1_ref[...],
                    preferred_element_type=jnp.float32)
        bn_act_store(z, p1_ref[...])

    @pl.when(step > 0)
    def _():
        z = jnp.dot(h_ref[...], wh_ref[...],
                    preferred_element_type=jnp.float32)
        bn_act_store(z, ph_ref[...])

    @pl.when(step == last)
    def _():
        out = jnp.dot(h_ref[...], wo_ref[...],
                      preferred_element_type=jnp.float32) + bo_ref[...]
        o_ref[...] = out.astype(o_ref.dtype)


def init_fcnet_params(key, ip_dim, num_nodes, op_dim, num_layers):
    """Deterministic synthetic parameters, pre-packed for the kernel.

    Linear weights are stored pre-transposed as (in, out) and zero-padded to
    128-lane multiples on their *output* feature axis (fc1 keeps its natural
    ip_dim input axis).  Per-layer [bias, gamma, beta] are packed as a
    (3, N_pad) f32 block.  Padded lanes have bias = gamma = beta = 0, which
    keeps them exactly zero through Linear+BN+act (do NOT pad gamma with 1s).
    """
    nn_p = _round_up(num_nodes, LANE)
    op_p = _round_up(op_dim, LANE)
    num_hidden = num_layers - 1

    def pack_params(b):
        p = jnp.zeros((3, nn_p), jnp.float32)
        p = p.at[0, :num_nodes].set(b)      # Linear bias
        p = p.at[1, :num_nodes].set(1.0)    # BN gamma (fresh BatchNorm1d)
        return p                            # row 2 (BN beta) stays 0

    params = {"ip_dim": ip_dim, "num_nodes": num_nodes, "op_dim": op_dim,
              "num_hidden": num_hidden}

    key, kw, kb = jax.random.split(key, 3)
    w1 = jax.random.normal(kw, (ip_dim, num_nodes), jnp.float32) * 0.1
    b1 = jax.random.normal(kb, (num_nodes,), jnp.float32) * 0.1
    params["fc1_w"] = jnp.pad(
        w1, ((0, 0), (0, nn_p - num_nodes))).astype(jnp.bfloat16)
    params["fc1_p"] = pack_params(b1)

    if num_hidden > 0:
        hw, hp = [], []
        for _ in range(num_hidden):
            key, kw, kb = jax.random.split(key, 3)
            w = jax.random.normal(kw, (num_nodes, num_nodes), jnp.float32) * 0.1
            b = jax.random.normal(kb, (num_nodes,), jnp.float32) * 0.1
            hw.append(jnp.pad(w, ((0, nn_p - num_nodes),
                                  (0, nn_p - num_nodes))))
            hp.append(pack_params(b))
        params["hid_w"] = jnp.stack(hw).astype(jnp.bfloat16)   # (L-1, N, N)
        params["hid_p"] = jnp.stack(hp)                        # (L-1, 3, N)
    else:
        # dummy slab so the streamed BlockSpec always has a valid block to map
        params["hid_w"] = jnp.zeros((1, nn_p, nn_p), jnp.bfloat16)
        params["hid_p"] = jnp.zeros((1, 3, nn_p), jnp.float32)

    key, kw, kb = jax.random.split(key, 3)
    wo = jax.random.normal(kw, (num_nodes, op_dim), jnp.float32) * 0.1
    bo = jax.random.normal(kb, (op_dim,), jnp.float32) * 0.1
    params["fc_out_w"] = jnp.pad(
        wo, ((0, nn_p - num_nodes), (0, op_p - op_dim))).astype(jnp.bfloat16)
    params["fc_out_b"] = jnp.pad(bo.reshape(1, -1),
                                 ((0, 0), (0, op_p - op_dim)))
    return params


def fcnet_forward(params, x, activation="relu"):
    # x.squeeze().view(B, -1)
    B = x.shape[0]
    xf = x.reshape(B, -1).astype(jnp.float32)
    ip_dim = params["ip_dim"]
    assert xf.shape[1] == ip_dim

    nn_p = params["fc1_w"].shape[1]
    op_p = params["fc_out_w"].shape[1]
    op_dim = params["op_dim"]
    num_steps = params["num_hidden"] + 1   # fc1 step + one per hidden layer

    fixed = lambda t: (0, 0)
    hid_idx = lambda t: (jnp.maximum(t - 1, 0), 0, 0)

    in_specs = [
        pl.BlockSpec((B, ip_dim), fixed),           # x (unpadded)
        pl.BlockSpec((ip_dim, nn_p), fixed),        # fc1 W
        pl.BlockSpec((3, nn_p), fixed),             # fc1 [bias, gamma, beta]
        pl.BlockSpec((None, nn_p, nn_p), hid_idx),  # streamed hidden W
        pl.BlockSpec((None, 3, nn_p), hid_idx),     # streamed hidden params
        pl.BlockSpec((nn_p, op_p), fixed),          # fc_out W
        pl.BlockSpec((1, op_p), fixed),             # fc_out bias
    ]
    out_spec = pl.BlockSpec((B, op_p), fixed)
    scratch = [pltpu.VMEM((B, nn_p), jnp.bfloat16)]  # resident activation

    # Explicit VMEM budget: double-buffered blocks + activation scratch + slack.
    block_bytes = (
        _nbytes((B, ip_dim), jnp.float32)
        + _nbytes((ip_dim, nn_p), jnp.bfloat16)
        + _nbytes((3, nn_p), jnp.float32)
        + _nbytes((nn_p, nn_p), jnp.bfloat16)
        + _nbytes((3, nn_p), jnp.float32)
        + _nbytes((nn_p, op_p), jnp.bfloat16)
        + _nbytes((1, op_p), jnp.float32)
        + _nbytes((B, op_p), jnp.float32))
    vmem_limit = max(
        2 * block_bytes + _nbytes((B, nn_p), jnp.bfloat16) + (4 << 20),
        16 << 20)

    kern = functools.partial(_fcnet_kernel, activation=activation)
    out = pl.pallas_call(
        kern,
        out_shape=jax.ShapeDtypeStruct((B, op_p), jnp.float32),
        grid_spec=pltpu.PrefetchScalarGridSpec(
            num_scalar_prefetch=0,
            grid=(num_steps,),
            in_specs=in_specs,
            out_specs=out_spec,
            scratch_shapes=scratch),
        compiler_params=pltpu.CompilerParams(
            # layer steps are strictly sequential (activation carried in VMEM)
            dimension_semantics=("arbitrary",),
            vmem_limit_bytes=vmem_limit),
    )(xf, params["fc1_w"], params["fc1_p"],
      params["hid_w"], params["hid_p"],
      params["fc_out_w"], params["fc_out_b"])
    return out[:, :op_dim]


if __name__ == "__main__":
    # small shapes: batch=8, ip_dim=16, num_nodes=32, op_dim=8, num_layers=3
    B, IP, NODES, OP, NUM_LAYERS = 8, 16, 32, 8, 3
    key = jax.random.PRNGKey(0)
    k_params, k_x = jax.random.split(key)
    params = init_fcnet_params(k_params, IP, NODES, OP, NUM_LAYERS)
    # input mimics a (B, 1, ip_dim) tensor that gets squeezed / flattened
    x = jax.random.normal(k_x, (B, 1, IP), jnp.float32)

    out = fcnet_forward(params, x, activation="relu")
    out = jax.block_until_ready(out)
    assert out.shape == (B, OP)
    print("KERNEL_OK")
</pallas_src>

<mosaic_0001>
module attributes {stable_mosaic.version = 11 : i64} {
  func.func @_fcnet_kernel(%arg0: i32, %arg1: memref<8x16xf32, #tpu.memory_space<vmem>>, %arg2: memref<16x128xbf16, #tpu.memory_space<vmem>>, %arg3: memref<3x128xf32, #tpu.memory_space<vmem>>, %arg4: memref<1x128x128xbf16, #tpu.memory_space<vmem>>, %arg5: memref<1x3x128xf32, #tpu.memory_space<vmem>>, %arg6: memref<128x128xbf16, #tpu.memory_space<vmem>>, %arg7: memref<1x128xf32, #tpu.memory_space<vmem>>, %arg8: memref<8x128xf32, #tpu.memory_space<vmem>>, %arg9: memref<8x128xbf16, #tpu.memory_space<vmem>>) attributes {dimension_semantics = [#tpu.dimension_semantics<arbitrary>], iteration_bounds = array<i64: 3>, scalar_prefetch = 0 : i64, scratch_operands = 1 : i64, tpu.core_type = #tpu.core_type<tc>, window_params = [{pipeline_mode = #tpu.pipeline_mode<synchronous>, transform_indices = @transform_0, window_bounds = array<i64: 8, 16>}, {pipeline_mode = #tpu.pipeline_mode<synchronous>, transform_indices = @transform_1, window_bounds = array<i64: 16, 128>}, {pipeline_mode = #tpu.pipeline_mode<synchronous>, transform_indices = @transform_2, window_bounds = array<i64: 3, 128>}, {transform_indices = @transform_3, window_bounds = array<i64: 1, 128, 128>}, {transform_indices = @transform_4, window_bounds = array<i64: 1, 3, 128>}, {pipeline_mode = #tpu.pipeline_mode<synchronous>, transform_indices = @transform_5, window_bounds = array<i64: 128, 128>}, {pipeline_mode = #tpu.pipeline_mode<synchronous>, transform_indices = @transform_6, window_bounds = array<i64: 1, 128>}, {pipeline_mode = #tpu.pipeline_mode<synchronous>, transform_indices = @transform_7, window_bounds = array<i64: 8, 128>}]} {
    %c0_i32 = arith.constant 0 : i32
    %0 = arith.cmpi eq, %arg0, %c0_i32 : i32
    %1 = arith.extui %0 : i1 to i32
    %c0_i32_0 = arith.constant 0 : i32
    %2 = arith.cmpi ne, %1, %c0_i32_0 : i32
    scf.if %2 {
      %c0 = arith.constant 0 : index
      %c0_4 = arith.constant 0 : index
      %9 = vector.load %arg1[%c0, %c0_4] : memref<8x16xf32, #tpu.memory_space<vmem>>, vector<8x16xf32>
      %10 = arith.truncf %9 : vector<8x16xf32> to vector<8x16xbf16>
      %c0_5 = arith.constant 0 : index
      %c0_6 = arith.constant 0 : index
      %11 = vector.load %arg2[%c0_5, %c0_6] : memref<16x128xbf16, #tpu.memory_space<vmem>>, vector<16x128xbf16>
      %cst = arith.constant dense<0.000000e+00> : vector<8x128xf32>
      %12 = tpu.matmul %10, %11, %cst {dimension_numbers = #tpu.dot_dimension_numbers<[1], [0], [0], [1], [0, 0, 1, 1], [], []>} : vector<8x16xbf16>, vector<16x128xbf16>, vector<8x128xf32> -> vector<8x128xf32>
      %c0_7 = arith.constant 0 : index
      %c0_8 = arith.constant 0 : index
      %13 = vector.load %arg3[%c0_7, %c0_8] : memref<3x128xf32, #tpu.memory_space<vmem>>, vector<3x128xf32>
      %14 = vector.extract_strided_slice %13 {offsets = [0, 0], sizes = [1, 128], strides = [1, 1]} : vector<3x128xf32> to vector<1x128xf32>
      %15 = vector.broadcast %14 : vector<1x128xf32> to vector<8x128xf32>
      %16 = arith.addf %12, %15 : vector<8x128xf32>
      %cst_9 = arith.constant dense<0.000000e+00> : vector<128xf32>
      %17 = vector.multi_reduction <add>, %16, %cst_9 [0] : vector<8x128xf32> to vector<128xf32>
      %18 = vector.shape_cast %17 : vector<128xf32> to vector<1x128xf32>
      %cst_10 = arith.constant 1.250000e-01 : f32
      %19 = vector.broadcast %cst_10 : f32 to vector<1x128xf32>
      %20 = arith.mulf %18, %19 : vector<1x128xf32>
      %21 = arith.mulf %16, %16 : vector<8x128xf32>
      %cst_11 = arith.constant dense<0.000000e+00> : vector<128xf32>
      %22 = vector.multi_reduction <add>, %21, %cst_11 [0] : vector<8x128xf32> to vector<128xf32>
      %23 = vector.shape_cast %22 : vector<128xf32> to vector<1x128xf32>
      %cst_12 = arith.constant 1.250000e-01 : f32
      %24 = vector.broadcast %cst_12 : f32 to vector<1x128xf32>
      %25 = arith.mulf %23, %24 : vector<1x128xf32>
      %26 = arith.mulf %20, %20 : vector<1x128xf32>
      %27 = arith.subf %25, %26 : vector<1x128xf32>
      %28 = vector.extract_strided_slice %13 {offsets = [1, 0], sizes = [1, 128], strides = [1, 1]} : vector<3x128xf32> to vector<1x128xf32>
      %cst_13 = arith.constant 9.99999974E-6 : f32
      %29 = vector.broadcast %cst_13 : f32 to vector<1x128xf32>
      %30 = arith.addf %27, %29 : vector<1x128xf32>
      %31 = math.rsqrt %30 : vector<1x128xf32>
      %32 = arith.mulf %28, %31 : vector<1x128xf32>
      %33 = vector.extract_strided_slice %13 {offsets = [2, 0], sizes = [1, 128], strides = [1, 1]} : vector<3x128xf32> to vector<1x128xf32>
      %34 = arith.mulf %20, %32 : vector<1x128xf32>
      %35 = arith.subf %33, %34 : vector<1x128xf32>
      %36 = vector.broadcast %32 : vector<1x128xf32> to vector<8x128xf32>
      %37 = arith.mulf %16, %36 : vector<8x128xf32>
      %38 = vector.broadcast %35 : vector<1x128xf32> to vector<8x128xf32>
      %39 = arith.addf %37, %38 : vector<8x128xf32>
      %cst_14 = arith.constant 0.000000e+00 : f32
      %40 = vector.broadcast %cst_14 : f32 to vector<8x128xf32>
      %41 = arith.maximumf %39, %40 : vector<8x128xf32>
      %42 = arith.truncf %41 : vector<8x128xf32> to vector<8x128xbf16>
      %c0_15 = arith.constant 0 : index
      %c0_16 = arith.constant 0 : index
      %43 = vector.load %arg9[%c0_15, %c0_16] : memref<8x128xbf16, #tpu.memory_space<vmem>>, vector<8x128xbf16>
      tpu.vector_store %arg9[%c0_15, %c0_16], %42 {strides = array<i32>} : memref<8x128xbf16, #tpu.memory_space<vmem>>, vector<8x128xbf16>,
    } else {
    }
    %c0_i32_1 = arith.constant 0 : i32
    %3 = arith.cmpi sgt, %arg0, %c0_i32_1 : i32
    %4 = arith.extui %3 : i1 to i32
    %c0_i32_2 = arith.constant 0 : i32
    %5 = arith.cmpi ne, %4, %c0_i32_2 : i32
    scf.if %5 {
      %c0 = arith.constant 0 : index
      %c0_4 = arith.constant 0 : index
      %9 = vector.load %arg9[%c0, %c0_4] : memref<8x128xbf16, #tpu.memory_space<vmem>>, vector<8x128xbf16>
      %c0_5 = arith.constant 0 : index
      %c0_6 = arith.constant 0 : index
      %c0_7 = arith.constant 0 : index
      %10 = vector.load %arg4[%c0_5, %c0_6, %c0_7] : memref<1x128x128xbf16, #tpu.memory_space<vmem>>, vector<1x128x128xbf16>
      %11 = vector.shape_cast %10 : vector<1x128x128xbf16> to vector<128x128xbf16>
      %cst = arith.constant dense<0.000000e+00> : vector<8x128xf32>
      %12 = tpu.matmul %9, %11, %cst {dimension_numbers = #tpu.dot_dimension_numbers<[1], [0], [0], [1], [0, 0, 1, 1], [], []>} : vector<8x128xbf16>, vector<128x128xbf16>, vector<8x128xf32> -> vector<8x128xf32>
      %c0_8 = arith.constant 0 : index
      %c0_9 = arith.constant 0 : index
      %c0_10 = arith.constant 0 : index
      %13 = vector.load %arg5[%c0_8, %c0_9, %c0_10] : memref<1x3x128xf32, #tpu.memory_space<vmem>>, vector<1x3x128xf32>
      %14 = vector.shape_cast %13 : vector<1x3x128xf32> to vector<3x128xf32>
      %15 = vector.extract_strided_slice %14 {offsets = [0, 0], sizes = [1, 128], strides = [1, 1]} : vector<3x128xf32> to vector<1x128xf32>
      %16 = vector.broadcast %15 : vector<1x128xf32> to vector<8x128xf32>
      %17 = arith.addf %12, %16 : vector<8x128xf32>
      %cst_11 = arith.constant dense<0.000000e+00> : vector<128xf32>
      %18 = vector.multi_reduction <add>, %17, %cst_11 [0] : vector<8x128xf32> to vector<128xf32>
      %19 = vector.shape_cast %18 : vector<128xf32> to vector<1x128xf32>
      %cst_12 = arith.constant 1.250000e-01 : f32
      %20 = vector.broadcast %cst_12 : f32 to vector<1x128xf32>
      %21 = arith.mulf %19, %20 : vector<1x128xf32>
      %22 = arith.mulf %17, %17 : vector<8x128xf32>
      %cst_13 = arith.constant dense<0.000000e+00> : vector<128xf32>
      %23 = vector.multi_reduction <add>, %22, %cst_13 [0] : vector<8x128xf32> to vector<128xf32>
      %24 = vector.shape_cast %23 : vector<128xf32> to vector<1x128xf32>
      %cst_14 = arith.constant 1.250000e-01 : f32
      %25 = vector.broadcast %cst_14 : f32 to vector<1x128xf32>
      %26 = arith.mulf %24, %25 : vector<1x128xf32>
      %27 = arith.mulf %21, %21 : vector<1x128xf32>
      %28 = arith.subf %26, %27 : vector<1x128xf32>
      %29 = vector.extract_strided_slice %14 {offsets = [1, 0], sizes = [1, 128], strides = [1, 1]} : vector<3x128xf32> to vector<1x128xf32>
      %cst_15 = arith.constant 9.99999974E-6 : f32
      %30 = vector.broadcast %cst_15 : f32 to vector<1x128xf32>
      %31 = arith.addf %28, %30 : vector<1x128xf32>
      %32 = math.rsqrt %31 : vector<1x128xf32>
      %33 = arith.mulf %29, %32 : vector<1x128xf32>
      %34 = vector.extract_strided_slice %14 {offsets = [2, 0], sizes = [1, 128], strides = [1, 1]} : vector<3x128xf32> to vector<1x128xf32>
      %35 = arith.mulf %21, %33 : vector<1x128xf32>
      %36 = arith.subf %34, %35 : vector<1x128xf32>
      %37 = vector.broadcast %33 : vector<1x128xf32> to vector<8x128xf32>
      %38 = arith.mulf %17, %37 : vector<8x128xf32>
      %39 = vector.broadcast %36 : vector<1x128xf32> to vector<8x128xf32>
      %40 = arith.addf %38, %39 : vector<8x128xf32>
      %cst_16 = arith.constant 0.000000e+00 : f32
      %41 = vector.broadcast %cst_16 : f32 to vector<8x128xf32>
      %42 = arith.maximumf %40, %41 : vector<8x128xf32>
      %43 = arith.truncf %42 : vector<8x128xf32> to vector<8x128xbf16>
      %c0_17 = arith.constant 0 : index
      %c0_18 = arith.constant 0 : index
      %44 = vector.load %arg9[%c0_17, %c0_18] : memref<8x128xbf16, #tpu.memory_space<vmem>>, vector<8x128xbf16>
      tpu.vector_store %arg9[%c0_17, %c0_18], %43 {strides = array<i32>} : memref<8x128xbf16, #tpu.memory_space<vmem>>, vector<8x128xbf16>,
    } else {
    }
    %c2_i32 = arith.constant 2 : i32
    %6 = arith.cmpi eq, %arg0, %c2_i32 : i32
    %7 = arith.extui %6 : i1 to i32
    %c0_i32_3 = arith.constant 0 : i32
    %8 = arith.cmpi ne, %7, %c0_i32_3 : i32
    scf.if %8 {
      %c0 = arith.constant 0 : index
      %c0_4 = arith.constant 0 : index
      %9 = vector.load %arg9[%c0, %c0_4] : memref<8x128xbf16, #tpu.memory_space<vmem>>, vector<8x128xbf16>
      %c0_5 = arith.constant 0 : index
      %c0_6 = arith.constant 0 : index
      %10 = vector.load %arg6[%c0_5, %c0_6] : memref<128x128xbf16, #tpu.memory_space<vmem>>, vector<128x128xbf16>
      %cst = arith.constant dense<0.000000e+00> : vector<8x128xf32>
      %11 = tpu.matmul %9, %10, %cst {dimension_numbers = #tpu.dot_dimension_numbers<[1], [0], [0], [1], [0, 0, 1, 1], [], []>} : vector<8x128xbf16>, vector<128x128xbf16>, vector<8x128xf32> -> vector<8x128xf32>
      %c0_7 = arith.constant 0 : index
      %c0_8 = arith.constant 0 : index
      %12 = vector.load %arg7[%c0_7, %c0_8] : memref<1x128xf32, #tpu.memory_space<vmem>>, vector<1x128xf32>
      %13 = vector.broadcast %12 : vector<1x128xf32> to vector<8x128xf32>
      %14 = arith.addf %11, %13 : vector<8x128xf32>
      %c0_9 = arith.constant 0 : index
      %c0_10 = arith.constant 0 : index
      %15 = vector.load %arg8[%c0_9, %c0_10] : memref<8x128xf32, #tpu.memory_space<vmem>>, vector<8x128xf32>
      tpu.vector_store %arg8[%c0_9, %c0_10], %14 {strides = array<i32>} : memref<8x128xf32, #tpu.memory_space<vmem>>, vector<8x128xf32>,
    } else {
    }
    return
  }
  func.func @transform_0(%arg0: i32) -> (i32, i32) {
    %c0_i32 = arith.constant 0 : i32
    %c0_i32_0 = arith.constant 0 : i32
    %c0_i32_1 = arith.constant 0 : i32
    return %c0_i32, %c0_i32_0 : i32, i32
  }
  func.func @transform_1(%arg0: i32) -> (i32, i32) {
    %c0_i32 = arith.constant 0 : i32
    %c0_i32_0 = arith.constant 0 : i32
    %c0_i32_1 = arith.constant 0 : i32
    return %c0_i32, %c0_i32_0 : i32, i32
  }
  func.func @transform_2(%arg0: i32) -> (i32, i32) {
    %c0_i32 = arith.constant 0 : i32
    %c0_i32_0 = arith.constant 0 : i32
    %c0_i32_1 = arith.constant 0 : i32
    return %c0_i32, %c0_i32_0 : i32, i32
  }
  func.func @transform_3(%arg0: i32) -> (i32, i32, i32) {
    %c1_i32 = arith.constant 1 : i32
    %0 = arith.subi %arg0, %c1_i32 : i32
    %c0_i32 = arith.constant 0 : i32
    %1 = arith.maxsi %0, %c0_i32 : i32
    %c0_i32_0 = arith.constant 0 : i32
    %c0_i32_1 = arith.constant 0 : i32
    %c0_i32_2 = arith.constant 0 : i32
    return %1, %c0_i32_0, %c0_i32_1 : i32, i32, i32
  }
  func.func @transform_4(%arg0: i32) -> (i32, i32, i32) {
    %c1_i32 = arith.constant 1 : i32
    %0 = arith.subi %arg0, %c1_i32 : i32
    %c0_i32 = arith.constant 0 : i32
    %1 = arith.maxsi %0, %c0_i32 : i32
    %c0_i32_0 = arith.constant 0 : i32
    %c0_i32_1 = arith.constant 0 : i32
    %c0_i32_2 = arith.constant 0 : i32
    return %1, %c0_i32_0, %c0_i32_1 : i32, i32, i32
  }
  func.func @transform_5(%arg0: i32) -> (i32, i32) {
    %c0_i32 = arith.constant 0 : i32
    %c0_i32_0 = arith.constant 0 : i32
    %c0_i32_1 = arith.constant 0 : i32
    return %c0_i32, %c0_i32_0 : i32, i32
  }
  func.func @transform_6(%arg0: i32) -> (i32, i32) {
    %c0_i32 = arith.constant 0 : i32
    %c0_i32_0 = arith.constant 0 : i32
    %c0_i32_1 = arith.constant 0 : i32
    return %c0_i32, %c0_i32_0 : i32, i32
  }
  func.func @transform_7(%arg0: i32) -> (i32, i32) {
    %c0_i32 = arith.constant 0 : i32
    %c0_i32_0 = arith.constant 0 : i32
    %c0_i32_1 = arith.constant 0 : i32
    return %c0_i32, %c0_i32_0 : i32, i32
  }
}

</mosaic_0001>

<bundles_post_ra>
// kernel: tpu_custom_call.1
= control target key start
LH: loop header
LB: loop body
LE: loop exit
PB: predicated region body
PF: predicated region fallthrough
CT: control target
= control target key end

     0   :  { %12 = vsyncpa [#allocation4], 0  ;;  %s1313_s0 = inlined_call_operand.vmem [shape: f32[8,16], index: 0, kind: input, shape index: {}]   ;;  %s1314_s1 = inlined_call_operand.hbm [shape: bf16[16,128], index: 1, kind: input, shape index: {}]   ;;  %s1315_s2 = inlined_call_operand.vmem [shape: f32[3,128], index: 2, kind: input, shape index: {}]   ;;  %s1316_s3 = inlined_call_operand.hbm [shape: bf16[2,128,128], index: 3, kind: input, shape index: {}]   ;;  %s1317_s4 = inlined_call_operand.vmem [shape: f32[2,3,128], index: 4, kind: input, shape index: {}]   ;;  %s1318_s5 = inlined_call_operand.hbm [shape: bf16[128,128], index: 5, kind: input, shape index: {}]   ;;  %s1319_s6 = inlined_call_operand.vmem [shape: f32[1,128], index: 6, kind: input, shape index: {}]   ;;  %s1320_s7 = inlined_call_operand.hbm [shape: f32[8,128], index: 7, kind: output, shape index: {}]  }
   0x1   :  { %13 = vsyncpa [#allocation7], 0 }
   0x2   :  { %15 = vsyncpa [#allocation7 + $0x1], 0 }
   0x3   :  { %16 = vsyncpa [#allocation5], 0  ;;  %s1154_s24 = smov 0   ;;  %s1156_s25 = smov 0  }
   0x4   :  { %s1158_s26 = smov 0   ;;  %s1160_s27 = smov 0  }
   0x5 LB: > { %s1173_s28 = sadd.s32 4294967295, %s1107_s27   ;;  %p111_p0 = scmp.ne.s32.totalorder %s1099_s25, %s1095_s24  ;;  %s1107_s27 = sphi %s1160_s27, %s1332_s27   ;;  %s1103_s26 = sphi %s1158_s26, %s1331_s26   ;;  %s1099_s25 = sphi %s1156_s25, %s1330_s25   ;;  %s1095_s24 = sphi %s1154_s24, %s1329_s24  }
   0x6   : > { %p112_p1 = scmp.eq.s32.totalorder %s1173_s28, 0  ;;  %p754_p2 = scmp.ge.s32.totalorder %s1107_s27, 1 }
   0x7   : > { %p217_p3 = scmp.lt.s32.totalorder %s1107_s27, 4  ;;  %p755_p4 = scmp.ne.s32.totalorder %s1173_s28, 0 }
   0x8   : > { %p1182_p5 = por %p112_p1, %p111_p0  ;;  %s248_s10 = sshll.u32 %s1318_s5, 4  ;;  %s249_s10 = int_to_ptr.hbm [resolvable:$true] %s248_s10 }
   0x9   : > { %p1186_p6 = pnand %p754_p2, %p217_p3  ;;  %s1109_s11 = smov [#allocation8]  }
   0xa   : > { %s250_s12 = sshll.u32 %s1109_s11, 4  ;;  %s231_s15 = sshll.u32 %s1314_s1, 4  ;;  %s251_s12 = int_to_ptr.vmem [resolvable:$true] %s250_s12  ;;  %s232_s15 = int_to_ptr.hbm [resolvable:$true] %s231_s15 }
   0xb   : > { %p883_p7 = pneg %p1186_p6  ;;  %s1321_s16 = smov 64  }
   0xc   : > { %s1322_s17 = smov 4   ;;  %s1112_s18 = smov [#allocation3]  }
   0xd   : > { %p884_p8 = pnand %p883_p7, %p112_p1  ;;  %s233_s19 = sshll.u32 %s1112_s18, 4  ;;  %s234_s19 = int_to_ptr.vmem [resolvable:$true] %s233_s19 }
   0xe   : > { %s1207_s20 = sadd.s32 1, %s1107_s27   ;;  %p90_p9 = scmp.gt.s32.totalorder %s1173_s28, 0 }
   0xf   : > { %889 = dma.hbm_to_vmem [thread:$0]  (!%p884_p8), %s249_s10, 1024, %s251_s12, [#allocation7], %s1321_s16, %s1321_s16, %s1322_s17  }
  0x10   : > { %886 = dma.hbm_to_vmem [thread:$0]  (!%p884_p8), %s232_s15, 128, %s234_s19, [#allocation4], %s1321_s16, %s1321_s16, %s1322_s17  }
  0x11   : > { %s751_s21 = sadd.s32 4294967295, %s1207_s20  ;;  %p105_p11 = scmp.ne.s32.totalorder %s1103_s26, %s1099_s25 }
  0x12   : > { %s91_s22 = scalar_select %p90_p9, %s1173_s28, 0 }
  0x13   : > { %p93_p10 = scmp.gt.s32.totalorder %s751_s21, 0  ;;  %s98_s23 = sadd.s32 1, %s1103_s26 }
  0x14   : > { %p106_p12 = scmp.eq.s32.totalorder %s1107_s27, 0  ;;  %p896_p0 = scmp.lt.s32.totalorder %s1107_s27, 3 }
  0x15   : > { %s1334_s21 = smov (!%p93_p10, %s751_s21), 0  ;;  %s267_s9 = sand.u32 1, %s1107_s27  }
  0x16   : > { %p1216_p13 = por %p106_p12, %p105_p11  ;;  %s95_s8 = ssub.s32 %s91_s22, %s1334_s21 }
  0x17   : > { %p96_p2 = scmp.eq.s32.totalorder %s95_s8, 0  ;;  %s269_s10 = sand.u32 1, %s1103_s26  }
  0x18   : > { %s758_s11 = sshll.u32 %s269_s10, 6  ;;  %s849_s12 = sshll.u32 %s91_s22, 6 }
  0x19   : > { %s1224_s13 = scalar_select %p96_p2, %s1103_s26, %s98_s23  }
  0x1a   : > { %s279_s18 = scalar_lea.hbm %s1316_s3, %s849_s12  ;;  %s271_s16 = scalar_lea.vmem [#allocation6], %s758_s11 }
  0x1b   : > { %s280_s19 = sshll.u32 %s279_s18, 4  ;;  %s282_s17 = sshll.u32 %s271_s16, 4  ;;  %s281_s19 = int_to_ptr.hbm [resolvable:$true] %s280_s19  ;;  %s283_s17 = int_to_ptr.vmem [resolvable:$true] %s282_s17 }
  0x1c   : > { %p1233_p3 = pnand %p896_p0, %p1216_p13  ;;  %s268_s8 = scalar_lea.sflag [#allocation7], %s267_s9 }
  0x1d   : > { %s1003_s22 = sshra.s32 %s281_s19, 4  ;;  %s1010_s11 = scalar_lea.hbm %s1316_s3, 128  ;;  %s1004_s22 = int_to_ptr.hbm [resolvable:$true] %s1003_s22 }
  0x1e   : > { %s1005_s23 = scalar_lea.hbm %s1004_s22, 64  ;;  %p1007_p8 = pneg %p1233_p3 }
  0x1f   : > { %p1006_p7 = scmp.ne.s32.totalorder %s1004_s22, %s1005_s23  ;;  %p1011_p11 = scmp.lt.s32.totalorder %s1004_s22, %s1316_s3 }
  0x20   : > { %p1012_p12 = scmp.lt.s32.totalorder %s1010_s11, %s1005_s23 }
  0x21   : > { %p1008_p9 = pnand %p1007_p8, %p1006_p7 }
  0x22   : > { %p1013_p13 = por %p1012_p12, %p1011_p11 }
  0x23   : > { %p1009_p10 = pneg %p1008_p9 }
  0x25   : > { %p1014_p0 = pnand %p1013_p13, %p1009_p10 }
  0x27   : > { %1017 = shalt.err (!%p1014_p0)
}
  0x28   : > { %s1327_s9 = smov 4   ;;  %s1328_s12 = smov 64  }
  0x29   : > { %893 = dma.hbm_to_vmem [thread:$0]  (!%p1233_p3), %s281_s19, 1024, %s283_s17, %s268_s8, %s1328_s12, %s1328_s12, %s1327_s9  }
  0x2a   : > { %307 = sbr.rel (%p1186_p6) target bundleno = 648 (0x288), region = 48 }
  0x2f   : > { %1078 = dma.done.wait (%p112_p1), [#allocation4], 128  }
  0x30   : > { %1080 = vsyncadd (%p112_p1), [#allocation4], 4294967168  ;;  %s314_s14 = sand.u32 1, %s1173_s28   ;;  %s316_s15 = sand.u32 1, %s1099_s25  }
  0x31   : > { %s764_s18 = sshll.u32 %s316_s15, 6  ;;  %s315_s21 = scalar_lea.sflag [#allocation7], %s314_s14 }
  0x32   : > { %s1258_s22 = scalar_lea.vmem [#allocation6], %s764_s18 }
  0x33   : > { %1082 = dma.done.wait (%p1182_p5), %s315_s21, 1024  }
  0x34   : > { %1084 = vsyncadd (%p1182_p5), %s315_s21, 4294966272 }
  0x35   : > { %1086 = dma.done.wait (%p112_p1), [#allocation7], 1024  }
  0x36   : > { %1088 = vsyncadd (%p112_p1), [#allocation7], 4294966272  ;;  %s766_s30 = sadd.s32 4294967295, %s1173_s28 }
  0x37   : > { %p361_p6 = scmp.gt.s32.totalorder %s766_s30, 0  ;;  %p767_p2 = scmp.lt.s32.totalorder %s766_s30, 1 }
  0x38   : > { %374 = sbr.rel (%p755_p4) target bundleno = 248 (0xf8), region = 64 }
  0x39   : > { %s1336_s30 = smov (!%p361_p6, %s766_s30), 0 }
  0x3a   : > { %s1338_s30 = smov (!%p767_p2, %s1336_s30), 1 }
  0x3b   : > { %s772_s17 = sshll.u32 %s1338_s30, 2 }
  0x3c   : > { %s1272_s23 = scalar_lea.vmem %s1317_s4, %s772_s17 }
  0x3d   : > { %v852_v0 = vld [vmem:[#allocation3] sm:$0xff]  ;;  %vm387_vm0 = vcmask 130048   ;;  %v379_v3 = vld [vmem:[%s1315_s2] sm:$0x7] }
  0x3e   : > { %v375_v1 = vld [vmem:[%s1313_s0] sm:$0xff]  ;;  %398 = vmatpush.bf16.msra.mxu0 %v852_v0  ;;  %v380_v4 = vperm.slane %v379_v3, 0 }
  0x3f   : > { %v376_v2 = vpack.c.bf16 %v375_v1, %v375_v1 }
  0x41   : > { %778 = vmatmul.msk.bf16.vlgmr.msra.gmra.mxu0 %vm387_vm0, %v376_v2 }
  0xbe   : > { %v400_v5 = vpop.f32.mrf.mxu0 }
  0xbf   : > { %v401_v6 = vadd.f32 %v400_v5, %v380_v4 }
  0xc1   : > { %v404_v7 = vrot.slane %v401_v6, 4  ;;  %v411_v8 = vmul.f32 %v401_v6, %v401_v6 }
  0xc3   : > { %v405_v9 = vadd.f32 %v404_v7, %v401_v6  ;;  %v412_v10 = vrot.slane %v411_v8, 4 }
  0xc5   : > { %v406_v11 = vrot.slane %v405_v9, 2  ;;  %v413_v12 = vadd.f32 %v412_v10, %v411_v8 }
  0xc6   : > { %v402_v13 = vpop.f32.mrf.mxu0 }
  0xc7   : > { %v407_v14 = vadd.f32 %v406_v11, %v405_v9  ;;  %v414_v15 = vrot.slane %v413_v12, 2 }
  0xc9   : > { %v408_v16 = vrot.slane %v407_v14, 1  ;;  %v415_v17 = vadd.f32 %v414_v15, %v413_v12 }
  0xcb   : > { %v409_v18 = vadd.f32 %v408_v16, %v407_v14  ;;  %v416_v19 = vrot.slane %v415_v17, 1 }
  0xcd   : > { %v410_v20 = vmul.f32 0.125, %v409_v18  ;;  %v417_v21 = vadd.f32 %v416_v19, %v415_v17 }
  0xcf   : > { %v418_v22 = vmul.f32 0.125, %v417_v21  ;;  %v419_v23 = vmul.f32 %v410_v20, %v410_v20 }
  0xd1   : > { %v420_v24 = vsub.f32 %v418_v22, %v419_v23 }
  0xd3   : > { %v421_v25 = vadd.f32 1e-05, %v420_v24 }
  0xd5   : > { %938 = vrsqrt.f32 %v421_v25  ;;  %vm428_vm2 = vweird.f32 %v421_v25 }
  0xdb   : > { %v939_v26 = vpop.eup %938 }
  0xdc   : > { %v423_v27 = vmul.f32 %v939_v26, %v421_v25  ;;  %vm429_vm1 = vweird.f32 %v939_v26 }
  0xdd   : > { %vm430_vm3 = vmor %vm428_vm2, %vm429_vm1 }
  0xde   : > { %v424_v28 = vmul.f32 %v939_v26, %v423_v27 }
  0xe0   : > { %v425_v29 = vmul.f32 0.5, %v424_v28 }
  0xe2   : > { %v426_v30 = vsub.f32 1.5, %v425_v29 }
  0xe4   : > { %v427_v31 = vmul.f32 %v939_v26, %v426_v30 }
  0xe6   : > { %v431_v32 = vsel %vm430_vm3, %v939_v26, %v427_v31 }
  0xe7   : > { %v432_v33 = vmul.f32 %v431_v32, %v379_v3 }
  0xe9   : > { %v433_v34 = vmul.f32 %v432_v33, %v410_v20  ;;  %v438_v36 = vperm.slane %v432_v33, 1 }
  0xeb   : > { %v435_v35 = vrot.slane %v433_v34, 7  ;;  %v439_v38 = vmul.f32 %v438_v36, %v401_v6 }
  0xed   : > { %v437_v37 = vsub.f32 %v379_v3, %v435_v35 }
  0xef   : > { %v440_v39 = vperm.slane %v437_v37, 2 }
  0xf1   : > { %v441_v40 = vadd.f32 %v440_v39, %v439_v38 }
  0xf3   : > { %v442_v41 = vmax.f32 %v441_v40, 0.0 }
  0xf5   : > { %v443_v42 = vpack.c.bf16 %v442_v41, %v442_v41 }
  0xf7   : > { %444 = vst [vmem:[#allocation2] sm:$0xf] %v443_v42 }
  0xf8 PF: > { %p779_p1 = scmp.le.s32.totalorder %s1173_s28, 0 }
  0xfa   : > { %448 = sbr.rel (%p779_p1) target bundleno = 470 (0x1d6), region = 68 }
  0xff   : > { %v860_v43 = vld [vmem:[%s1258_s22 + $0x38] sm:$0xff]  ;;  %v859_v44 = vld [vmem:[%s1258_s22 + $0x30] sm:$0xff]  ;;  %v858_v45 = vld [vmem:[%s1258_s22 + $0x28] sm:$0xff] }
 0x100   : > { %516 = vmatpush.bf16.msra.mxu0 %v860_v43  ;;  %v857_v46 = vld [vmem:[%s1258_s22 + $0x20] sm:$0xff]  ;;  %v856_v47 = vld [vmem:[%s1258_s22 + $0x18] sm:$0xff]  ;;  %v855_v48 = vld [vmem:[%s1258_s22 + $0x10] sm:$0xff] }
 0x101   : > { %v854_v49 = vld [vmem:[%s1258_s22 + $0x8] sm:$0xff]  ;;  %v853_v50 = vld [vmem:[%s1258_s22] sm:$0xff]  ;;  %v449_v51 = vld [vmem:[#allocation2] sm:$0xf] }
 0x102   : > { %v466_v52 = vld [vmem:[%s1272_s23] sm:$0x7] }
 0x103   : > { %v467_v53 = vperm.slane %v466_v52, 0 }
 0x104   : > { %517 = vmatpush.bf16.msra.mxu0 %v859_v44 }
 0x108   : > { %518 = vmatpush.bf16.msra.mxu0 %v858_v45 }
 0x10c   : > { %519 = vmatpush.bf16.msra.mxu0 %v857_v46 }
 0x110   : > { %520 = vmatpush.bf16.msra.mxu0 %v856_v47 }
 0x114   : > { %521 = vmatpush.bf16.msra.mxu0 %v855_v48 }
 0x118   : > { %522 = vmatpush.bf16.msra.mxu0 %v854_v49 }
 0x11c   : > { %523 = vmatpush.bf16.msra.mxu0 %v853_v50 }
 0x11f   : > { %524 = vmatmul.bf16.vlgmr.msra.gmra.mxu0 %v449_v51 }
 0x19c   : > { %v525_v54 = vpop.f32.mrf.mxu0 }
 0x19d   : > { %v526_v55 = vadd.f32 %v525_v54, %v467_v53 }
 0x19f   : > { %v529_v56 = vrot.slane %v526_v55, 4  ;;  %v536_v57 = vmul.f32 %v526_v55, %v526_v55 }
 0x1a1   : > { %v530_v58 = vadd.f32 %v529_v56, %v526_v55  ;;  %v537_v59 = vrot.slane %v536_v57, 4 }
 0x1a3   : > { %v531_v60 = vrot.slane %v530_v58, 2  ;;  %v538_v61 = vadd.f32 %v537_v59, %v536_v57 }
 0x1a4   : > { %v527_v62 = vpop.f32.mrf.mxu0 }
 0x1a5   : > { %v532_v63 = vadd.f32 %v531_v60, %v530_v58  ;;  %v539_v0 = vrot.slane %v538_v61, 2 }
 0x1a7   : > { %v533_v1 = vrot.slane %v532_v63, 1  ;;  %v540_v2 = vadd.f32 %v539_v0, %v538_v61 }
 0x1a9   : > { %v534_v3 = vadd.f32 %v533_v1, %v532_v63  ;;  %v541_v4 = vrot.slane %v540_v2, 1 }
 0x1ab   : > { %v535_v5 = vmul.f32 0.125, %v534_v3  ;;  %v542_v6 = vadd.f32 %v541_v4, %v540_v2 }
 0x1ad   : > { %v543_v7 = vmul.f32 0.125, %v542_v6  ;;  %v544_v8 = vmul.f32 %v535_v5, %v535_v5 }
 0x1af   : > { %v545_v9 = vsub.f32 %v543_v7, %v544_v8 }
 0x1b1   : > { %v546_v10 = vadd.f32 1e-05, %v545_v9 }
 0x1b3   : > { %940 = vrsqrt.f32 %v546_v10  ;;  %vm553_vm5 = vweird.f32 %v546_v10 }
 0x1b9   : > { %v941_v11 = vpop.eup %940 }
 0x1ba   : > { %v548_v12 = vmul.f32 %v941_v11, %v546_v10  ;;  %vm554_vm4 = vweird.f32 %v941_v11 }
 0x1bb   : > { %vm555_vm6 = vmor %vm553_vm5, %vm554_vm4 }
 0x1bc   : > { %v549_v13 = vmul.f32 %v941_v11, %v548_v12 }
 0x1be   : > { %v550_v14 = vmul.f32 0.5, %v549_v13 }
 0x1c0   : > { %v551_v15 = vsub.f32 1.5, %v550_v14 }
 0x1c2   : > { %v552_v16 = vmul.f32 %v941_v11, %v551_v15 }
 0x1c4   : > { %v556_v17 = vsel %vm555_vm6, %v941_v11, %v552_v16 }
 0x1c5   : > { %v557_v18 = vmul.f32 %v556_v17, %v466_v52 }
 0x1c7   : > { %v558_v19 = vmul.f32 %v557_v18, %v535_v5  ;;  %v563_v21 = vperm.slane %v557_v18, 1 }
 0x1c9   : > { %v560_v20 = vrot.slane %v558_v19, 7  ;;  %v564_v23 = vmul.f32 %v563_v21, %v526_v55 }
 0x1cb   : > { %v562_v22 = vsub.f32 %v466_v52, %v560_v20 }
 0x1cd   : > { %v565_v24 = vperm.slane %v562_v22, 2 }
 0x1cf   : > { %v566_v25 = vadd.f32 %v565_v24, %v564_v23 }
 0x1d1   : > { %v567_v26 = vmax.f32 %v566_v25, 0.0 }
 0x1d3   : > { %v568_v27 = vpack.c.bf16 %v567_v26, %v567_v26 }
 0x1d5   : > { %569 = vst [vmem:[#allocation2] sm:$0xf] %v568_v27 }
 0x1d6 PF: > { %p812_p4 = scmp.ne.s32.totalorder %s1173_s28, 2 }
 0x1d8   : > { %573 = sbr.rel (%p812_p4) target bundleno = 643 (0x283), region = 72 }
 0x1dd   : > { %v868_v28 = vld [vmem:[#allocation8 + $0x38] sm:$0xff]  ;;  %v867_v29 = vld [vmem:[#allocation8 + $0x30] sm:$0xff]  ;;  %v866_v30 = vld [vmem:[#allocation8 + $0x28] sm:$0xff] }
 0x1de   : > { %643 = vmatpush.bf16.msra.mxu0 %v868_v28  ;;  %v865_v31 = vld [vmem:[#allocation8 + $0x20] sm:$0xff]  ;;  %v864_v32 = vld [vmem:[#allocation8 + $0x18] sm:$0xff]  ;;  %v863_v33 = vld [vmem:[#allocation8 + $0x10] sm:$0xff] }
 0x1df   : > { %v862_v34 = vld [vmem:[#allocation8 + $0x8] sm:$0xff]  ;;  %v861_v35 = vld [vmem:[#allocation8] sm:$0xff]  ;;  %v574_v36 = vld [vmem:[#allocation2] sm:$0xf] }
 0x1e0   : > { %v942_v37 = vld [vmem:[%s1319_s6] ss:$0 sm:$0xff] }
 0x1e2   : > { %644 = vmatpush.bf16.msra.mxu0 %v867_v29 }
 0x1e6   : > { %645 = vmatpush.bf16.msra.mxu0 %v866_v30 }
 0x1ea   : > { %646 = vmatpush.bf16.msra.mxu0 %v865_v31 }
 0x1ee   : > { %647 = vmatpush.bf16.msra.mxu0 %v864_v32 }
 0x1f2   : > { %648 = vmatpush.bf16.msra.mxu0 %v863_v33 }
 0x1f6   : > { %649 = vmatpush.bf16.msra.mxu0 %v862_v34 }
 0x1fa   : > { %650 = vmatpush.bf16.msra.mxu0 %v861_v35 }
 0x1fd   : > { %651 = vmatmul.bf16.vlgmr.msra.gmra.mxu0 %v574_v36 }
 0x27a   : > { %v652_v38 = vpop.f32.mrf.mxu0 }
 0x27b   : > { %v653_v39 = vadd.f32 %v942_v37, %v652_v38 }
 0x27d   : > { %656 = vst [vmem:[#allocation9] sm:$0xff] %v653_v39 }
 0x282   : > { %v654_v40 = vpop.f32.mrf.mxu0 }
 0x283 PF: > { %p899_p5 = scmp.eq.s32.totalorder %s1173_s28, 2  ;;  %s1113_s9 = smov [#allocation9]  }
 0x284   : > { %s663_s12 = sshll.u32 %s1113_s9, 4  ;;  %s665_s18 = sshll.u32 %s1320_s7, 4  ;;  %s664_s12 = int_to_ptr.vmem [resolvable:$true] %s663_s12  ;;  %s666_s18 = int_to_ptr.hbm [resolvable:$true] %s665_s18 }
 0x285   : > { %880 = dma.vmem_to_hbm [thread:$0]  (%p899_p5), %s664_s12, 128, %s666_s18, [#allocation5]  }
 0x286   : > { %1090 = dma.done.wait (%p899_p5), [#allocation5], 128  }
 0x287   : > { %1092 = vsyncadd (%p899_p5), [#allocation5], 4294967168 }
 0x288 PF: > { %p19_p3 = scmp.ge.s32.totalorder %s1207_s20, 5   ;;  %s1329_s24 = smov %s1099_s25 }
 0x289   : > { %s1330_s25 = smov %s1103_s26  ;;  %s1331_s26 = smov %s1224_s13 }
 0x28a   : > { %s1332_s27 = smov %s1207_s20  ;;  %21 = sbr.rel (!%p19_p3) target bundleno = 5 (0x5), region = 109 }
 0x28f   :  { %679 = vsyncpa [#allocation4], 1 }
 0x290   :  { %681 = vsyncpa [#allocation4 + $0x1], 1 }
 0x291   :  { %682 = vsyncpa [#allocation7], 1 }
 0x292   :  { %684 = vsyncpa [#allocation7 + $0x1], 1 }
 0x293   :  { %685 = vsyncpa [#allocation5], 1 }
 0x294   :  { %687 = vsyncpa [#allocation5 + $0x1], 1 }

</bundles_post_ra>
